<compile_context>
chip_gen: v6e
topology: v6e:2x2x1
jax: 0.10.0
libtpu: 0.0.40
codegen_flags: <defaults>
</compile_context>

<pallas_src>
import jax
import jax.numpy as jnp
from jax.experimental import pallas as pl
from jax.experimental.pallas import tpu as pltpu


# ---- problem sizes (consistent with the module's shapes) ----
OBS_DIMENSION = 16
HIDDEN_L1_ACTOR = 64
HIDDEN_L2_ACTOR = 32
ACTION_DIMENSION = 4
BATCH = 8
BN_EPS = 1e-5

# ---- packed parameter slab layout: rows x 128 lanes, f32 ----
LANES = 128
R_W1 = 0                                    # (OBS, H1)          rows [0, 16)
R_B1 = R_W1 + OBS_DIMENSION                 # (1, H1)             row 16
R_GAMMA = R_B1 + 1                          # (1, H1)             row 17
R_BETA = R_GAMMA + 1                        # (1, H1)             row 18
R_W2 = R_BETA + 1                           # (H1, H2)            rows [19, 83)
R_B2 = R_W2 + HIDDEN_L1_ACTOR               # (1, H2)             row 83
R_W3 = R_B2 + 1                             # (H2, A)             rows [84, 116)
R_B3 = R_W3 + HIDDEN_L2_ACTOR               # (1, A)              row 116
ROWS_USED = R_B3 + 1                        # 117
SLAB_ROWS = ((ROWS_USED + 7) // 8) * 8      # 120 (sublane aligned)


def actor_kernel(x_ref, p_ref, out_ref):
    """One grid step = one full forward pass over a (B, OBS) batch.

    x_ref : (1, B, OBS)  current batch of states
    p_ref : (SLAB_ROWS, 128)  packed parameters (resident across grid steps)
    out_ref: (1, B, A)
    """
    x = x_ref[0]                                                  # (B, OBS)

    # Static slices of the packed slab (zero-cost ref views + masked loads).
    w1 = p_ref[R_W1:R_W1 + OBS_DIMENSION, :HIDDEN_L1_ACTOR]       # (OBS, H1)
    b1 = p_ref[R_B1:R_B1 + 1, :HIDDEN_L1_ACTOR]                   # (1, H1)
    gamma = p_ref[R_GAMMA:R_GAMMA + 1, :HIDDEN_L1_ACTOR]          # (1, H1)
    beta = p_ref[R_BETA:R_BETA + 1, :HIDDEN_L1_ACTOR]             # (1, H1)
    w2 = p_ref[R_W2:R_W2 + HIDDEN_L1_ACTOR, :HIDDEN_L2_ACTOR]     # (H1, H2)
    b2 = p_ref[R_B2:R_B2 + 1, :HIDDEN_L2_ACTOR]                   # (1, H2)
    w3 = p_ref[R_W3:R_W3 + HIDDEN_L2_ACTOR, :ACTION_DIMENSION]    # (H2, A)
    b3 = p_ref[R_B3:R_B3 + 1, :ACTION_DIMENSION]                  # (1, A)

    # fc1 + ReLU
    h1 = jnp.dot(x, w1, preferred_element_type=jnp.float32) + b1
    h1 = jnp.maximum(h1, 0.0)                                     # (B, H1)

    # BatchNorm1d (training mode): single fused reduction for mean and E[x^2].
    # [h1 | h1*h1] is exactly 64+64 = 128 lanes -> one sublane reduce.
    inv_b = 1.0 / h1.shape[0]
    stacked = jnp.concatenate([h1, h1 * h1], axis=-1)             # (B, 128)
    sums = jnp.sum(stacked, axis=0, keepdims=True) * inv_b        # (1, 128)
    mean = sums[:, :HIDDEN_L1_ACTOR]                              # (1, H1)
    ex2 = sums[:, HIDDEN_L1_ACTOR:]                               # (1, H1)
    var = jnp.maximum(ex2 - mean * mean, 0.0)                     # guard cancellation
    # Folded affine: one scale/shift FMA pass over the activation.
    scale = gamma * jax.lax.rsqrt(var + BN_EPS)                   # (1, H1)
    shift = beta - mean * scale                                   # (1, H1)
    h1n = h1 * scale + shift                                      # (B, H1)

    # fc2 + ReLU
    h2 = jnp.dot(h1n, w2, preferred_element_type=jnp.float32) + b2
    h2 = jnp.maximum(h2, 0.0)                                     # (B, H2)

    # fc3 + tanh
    y = jnp.dot(h2, w3, preferred_element_type=jnp.float32) + b3
    out_ref[0] = jnp.tanh(y)                                      # (B, A)


def pack_params(params):
    """Pack (w1,b1,w2,b2,w3,b3,gamma,beta) into one (SLAB_ROWS, 128) f32 slab."""
    w1, b1, w2, b2, w3, b3, gamma, beta = params
    slab = jnp.zeros((SLAB_ROWS, LANES), jnp.float32)
    slab = slab.at[R_W1:R_W1 + OBS_DIMENSION, :HIDDEN_L1_ACTOR].set(w1)
    slab = slab.at[R_B1, :HIDDEN_L1_ACTOR].set(b1.reshape(-1))
    slab = slab.at[R_GAMMA, :HIDDEN_L1_ACTOR].set(gamma.reshape(-1))
    slab = slab.at[R_BETA, :HIDDEN_L1_ACTOR].set(beta.reshape(-1))
    slab = slab.at[R_W2:R_W2 + HIDDEN_L1_ACTOR, :HIDDEN_L2_ACTOR].set(w2)
    slab = slab.at[R_B2, :HIDDEN_L2_ACTOR].set(b2.reshape(-1))
    slab = slab.at[R_W3:R_W3 + HIDDEN_L2_ACTOR, :ACTION_DIMENSION].set(w3)
    slab = slab.at[R_B3, :ACTION_DIMENSION].set(b3.reshape(-1))
    return slab


def actor_forward(state, packed_slab):
    """state: (B, OBS) or (N, B, OBS) float32; returns (B, A) or (N, B, A).

    A leading (N,) grid axis amortizes the single weight-slab DMA across many
    forward steps (the slab's index_map always returns block (0,0), so it is
    loaded once and stays VMEM-resident). BN statistics are computed per step
    over that step's B rows, matching the module's per-forward behavior.
    """
    if state.ndim == 1:  # mirror `if state.dim() == 1: unsqueeze(0)`
        state = state[None, :]
        # TODO(synk): PyTorch BatchNorm1d(train) raises for batch size 1; here
        # var=0 so the normalized output collapses to beta before fc2.
    single = state.ndim == 2
    states = state[None] if single else state             # (N, B, OBS)
    N, B, _ = states.shape

    out = pl.pallas_call(
        actor_kernel,
        out_shape=jax.ShapeDtypeStruct((N, B, ACTION_DIMENSION), jnp.float32),
        grid_spec=pltpu.PrefetchScalarGridSpec(
            num_scalar_prefetch=0,
            grid=(N,),
            in_specs=[
                pl.BlockSpec((1, B, OBS_DIMENSION), lambda i: (i, 0, 0)),
                # Same block for every step -> weights DMA'd once, resident.
                pl.BlockSpec((SLAB_ROWS, LANES), lambda i: (0, 0)),
            ],
            out_specs=pl.BlockSpec((1, B, ACTION_DIMENSION), lambda i: (i, 0, 0)),
        ),
        compiler_params=pltpu.CompilerParams(
            dimension_semantics=("arbitrary",)),
    )(states, packed_slab)

    return out[0] if single else out


def init_params(key):
    """Deterministic init mimicking the module:
    - fc weights: xavier_normal (std = sqrt(2/(fan_in+fan_out)))
    - fc biases : PyTorch default uniform(-1/sqrt(fan_in), 1/sqrt(fan_in))
    - bn1       : gamma=1, beta=0
    Weights stored as (in, out); biases as (1, out).
    """
    keys = jax.random.split(key, 6)

    def xavier(k, fan_in, fan_out):
        std = (2.0 / (fan_in + fan_out)) ** 0.5
        return std * jax.random.normal(k, (fan_in, fan_out), jnp.float32)

    def bias(k, fan_in, fan_out):
        bound = 1.0 / (fan_in ** 0.5)
        return jax.random.uniform(k, (1, fan_out), jnp.float32, -bound, bound)

    w1 = xavier(keys[0], OBS_DIMENSION, HIDDEN_L1_ACTOR)
    b1 = bias(keys[1], OBS_DIMENSION, HIDDEN_L1_ACTOR)
    w2 = xavier(keys[2], HIDDEN_L1_ACTOR, HIDDEN_L2_ACTOR)
    b2 = bias(keys[3], HIDDEN_L1_ACTOR, HIDDEN_L2_ACTOR)
    w3 = xavier(keys[4], HIDDEN_L2_ACTOR, ACTION_DIMENSION)
    b3 = bias(keys[5], HIDDEN_L2_ACTOR, ACTION_DIMENSION)
    gamma = jnp.ones((1, HIDDEN_L1_ACTOR), jnp.float32)
    beta = jnp.zeros((1, HIDDEN_L1_ACTOR), jnp.float32)
    return (w1, b1, w2, b2, w3, b3, gamma, beta)


def _reference(state, params):
    """Plain-JAX reference mirroring the PyTorch forward (train-mode BN)."""
    w1, b1, w2, b2, w3, b3, gamma, beta = params
    h1 = jnp.maximum(state @ w1 + b1, 0.0)
    mean = jnp.mean(h1, axis=0, keepdims=True)
    var = jnp.mean((h1 - mean) ** 2, axis=0, keepdims=True)
    h1n = (h1 - mean) / jnp.sqrt(var + BN_EPS) * gamma + beta
    h2 = jnp.maximum(h1n @ w2 + b2, 0.0)
    return jnp.tanh(h2 @ w3 + b3)


if __name__ == "__main__":
    key = jax.random.PRNGKey(0)
    k_param, k_state, k_multi = jax.random.split(key, 3)
    params = init_params(k_param)
    slab = pack_params(params)

    # Single forward-pass batch (matches the module's usual call).
    state = jax.random.normal(k_state, (BATCH, OBS_DIMENSION), jnp.float32)
    out = jax.block_until_ready(actor_forward(state, slab))
    ref = _reference(state, params)
    assert out.shape == (BATCH, ACTION_DIMENSION)
    assert jnp.allclose(out, ref, atol=1e-4, rtol=1e-4)

    # Stacked rollout: N forward passes in one kernel launch; the weight slab
    # is DMA'd once and reused across all grid steps.
    N = 4
    states = jax.random.normal(k_multi, (N, BATCH, OBS_DIMENSION), jnp.float32)
    out_n = jax.block_until_ready(actor_forward(states, slab))
    ref_n = jnp.stack([_reference(states[i], params) for i in range(N)])
    assert out_n.shape == (N, BATCH, ACTION_DIMENSION)
    assert jnp.allclose(out_n, ref_n, atol=1e-4, rtol=1e-4)

    print("KERNEL_OK")
</pallas_src>

<mosaic_0001>
module attributes {stable_mosaic.version = 11 : i64} {
  func.func @actor_kernel(%arg0: i32, %arg1: memref<1x8x16xf32, #tpu.memory_space<vmem>>, %arg2: memref<120x128xf32, #tpu.memory_space<vmem>>, %arg3: memref<1x8x4xf32, #tpu.memory_space<vmem>>) attributes {dimension_semantics = [#tpu.dimension_semantics<arbitrary>], iteration_bounds = array<i64: 1>, scalar_prefetch = 0 : i64, scratch_operands = 0 : i64, tpu.core_type = #tpu.core_type<tc>, window_params = [{transform_indices = @transform_0, window_bounds = array<i64: 1, 8, 16>}, {pipeline_mode = #tpu.pipeline_mode<synchronous>, transform_indices = @transform_1, window_bounds = array<i64: 120, 128>}, {transform_indices = @transform_2, window_bounds = array<i64: 1, 8, 4>}]} {
    %c0 = arith.constant 0 : index
    %c0_0 = arith.constant 0 : index
    %c0_1 = arith.constant 0 : index
    %0 = vector.load %arg1[%c0, %c0_0, %c0_1] : memref<1x8x16xf32, #tpu.memory_space<vmem>>, vector<1x8x16xf32>
    %1 = vector.shape_cast %0 : vector<1x8x16xf32> to vector<8x16xf32>
    %c0_2 = arith.constant 0 : index
    %c0_3 = arith.constant 0 : index
    %2 = vector.load %arg2[%c0_2, %c0_3] : memref<120x128xf32, #tpu.memory_space<vmem>>, vector<16x64xf32>
    %c16 = arith.constant 16 : index
    %c0_4 = arith.constant 0 : index
    %3 = vector.load %arg2[%c16, %c0_4] : memref<120x128xf32, #tpu.memory_space<vmem>>, vector<1x64xf32>
    %c17 = arith.constant 17 : index
    %c0_5 = arith.constant 0 : index
    %4 = vector.load %arg2[%c17, %c0_5] : memref<120x128xf32, #tpu.memory_space<vmem>>, vector<1x64xf32>
    %c18 = arith.constant 18 : index
    %c0_6 = arith.constant 0 : index
    %5 = vector.load %arg2[%c18, %c0_6] : memref<120x128xf32, #tpu.memory_space<vmem>>, vector<1x64xf32>
    %c19 = arith.constant 19 : index
    %c0_7 = arith.constant 0 : index
    %6 = vector.load %arg2[%c19, %c0_7] : memref<120x128xf32, #tpu.memory_space<vmem>>, vector<64x32xf32>
    %c83 = arith.constant 83 : index
    %c0_8 = arith.constant 0 : index
    %7 = vector.load %arg2[%c83, %c0_8] : memref<120x128xf32, #tpu.memory_space<vmem>>, vector<1x32xf32>
    %c84 = arith.constant 84 : index
    %c0_9 = arith.constant 0 : index
    %8 = vector.load %arg2[%c84, %c0_9] : memref<120x128xf32, #tpu.memory_space<vmem>>, vector<32x4xf32>
    %c116 = arith.constant 116 : index
    %c0_10 = arith.constant 0 : index
    %9 = vector.load %arg2[%c116, %c0_10] : memref<120x128xf32, #tpu.memory_space<vmem>>, vector<1x4xf32>
    %cst = arith.constant dense<0.000000e+00> : vector<8x64xf32>
    %10 = tpu.matmul %1, %2, %cst {dimension_numbers = #tpu.dot_dimension_numbers<[1], [0], [0], [1], [0, 0, 1, 1], [], []>} : vector<8x16xf32>, vector<16x64xf32>, vector<8x64xf32> -> vector<8x64xf32>
    %11 = vector.broadcast %3 : vector<1x64xf32> to vector<8x64xf32>
    %12 = arith.addf %10, %11 : vector<8x64xf32>
    %cst_11 = arith.constant 0.000000e+00 : f32
    %13 = vector.broadcast %cst_11 : f32 to vector<8x64xf32>
    %14 = arith.maximumf %12, %13 : vector<8x64xf32>
    %15 = arith.mulf %14, %14 : vector<8x64xf32>
    %16 = tpu.concatenate %14, %15 in 1 : vector<8x64xf32>, vector<8x64xf32> -> vector<8x128xf32>
    %cst_12 = arith.constant dense<0.000000e+00> : vector<128xf32>
    %17 = vector.multi_reduction <add>, %16, %cst_12 [0] : vector<8x128xf32> to vector<128xf32>
    %18 = vector.shape_cast %17 : vector<128xf32> to vector<1x128xf32>
    %cst_13 = arith.constant 1.250000e-01 : f32
    %19 = vector.broadcast %cst_13 : f32 to vector<1x128xf32>
    %20 = arith.mulf %18, %19 : vector<1x128xf32>
    %21 = vector.extract_strided_slice %20 {offsets = [0, 0], sizes = [1, 64], strides = [1, 1]} : vector<1x128xf32> to vector<1x64xf32>
    %22 = vector.extract_strided_slice %20 {offsets = [0, 64], sizes = [1, 64], strides = [1, 1]} : vector<1x128xf32> to vector<1x64xf32>
    %23 = arith.mulf %21, %21 : vector<1x64xf32>
    %24 = arith.subf %22, %23 : vector<1x64xf32>
    %cst_14 = arith.constant 0.000000e+00 : f32
    %25 = vector.broadcast %cst_14 : f32 to vector<1x64xf32>
    %26 = arith.maximumf %24, %25 : vector<1x64xf32>
    %cst_15 = arith.constant 9.99999974E-6 : f32
    %27 = vector.broadcast %cst_15 : f32 to vector<1x64xf32>
    %28 = arith.addf %26, %27 : vector<1x64xf32>
    %29 = math.rsqrt %28 : vector<1x64xf32>
    %30 = arith.mulf %4, %29 : vector<1x64xf32>
    %31 = arith.mulf %21, %30 : vector<1x64xf32>
    %32 = arith.subf %5, %31 : vector<1x64xf32>
    %33 = vector.broadcast %30 : vector<1x64xf32> to vector<8x64xf32>
    %34 = arith.mulf %14, %33 : vector<8x64xf32>
    %35 = vector.broadcast %32 : vector<1x64xf32> to vector<8x64xf32>
    %36 = arith.addf %34, %35 : vector<8x64xf32>
    %cst_16 = arith.constant dense<0.000000e+00> : vector<8x32xf32>
    %37 = tpu.matmul %36, %6, %cst_16 {dimension_numbers = #tpu.dot_dimension_numbers<[1], [0], [0], [1], [0, 0, 1, 1], [], []>} : vector<8x64xf32>, vector<64x32xf32>, vector<8x32xf32> -> vector<8x32xf32>
    %38 = vector.broadcast %7 : vector<1x32xf32> to vector<8x32xf32>
    %39 = arith.addf %37, %38 : vector<8x32xf32>
    %cst_17 = arith.constant 0.000000e+00 : f32
    %40 = vector.broadcast %cst_17 : f32 to vector<8x32xf32>
    %41 = arith.maximumf %39, %40 : vector<8x32xf32>
    %cst_18 = arith.constant dense<0.000000e+00> : vector<8x4xf32>
    %42 = tpu.matmul %41, %8, %cst_18 {dimension_numbers = #tpu.dot_dimension_numbers<[1], [0], [0], [1], [0, 0, 1, 1], [], []>} : vector<8x32xf32>, vector<32x4xf32>, vector<8x4xf32> -> vector<8x4xf32>
    %43 = vector.broadcast %9 : vector<1x4xf32> to vector<8x4xf32>
    %44 = arith.addf %42, %43 : vector<8x4xf32>
    %45 = math.tanh %44 : vector<8x4xf32>
    %c0_19 = arith.constant 0 : index
    %c0_20 = arith.constant 0 : index
    %c0_21 = arith.constant 0 : index
    %46 = vector.load %arg3[%c0_19, %c0_20, %c0_21] : memref<1x8x4xf32, #tpu.memory_space<vmem>>, vector<1x8x4xf32>
    %47 = vector.shape_cast %46 : vector<1x8x4xf32> to vector<8x4xf32>
    %48 = vector.shape_cast %45 : vector<8x4xf32> to vector<1x8x4xf32>
    tpu.vector_store %arg3[%c0_19, %c0_20, %c0_21], %48 {strides = array<i32>} : memref<1x8x4xf32, #tpu.memory_space<vmem>>, vector<1x8x4xf32>,
    return
  }
  func.func @transform_0(%arg0: i32) -> (i32, i32, i32) {
    %c0_i32 = arith.constant 0 : i32
    %c0_i32_0 = arith.constant 0 : i32
    %c0_i32_1 = arith.constant 0 : i32
    return %arg0, %c0_i32, %c0_i32_0 : i32, i32, i32
  }
  func.func @transform_1(%arg0: i32) -> (i32, i32) {
    %c0_i32 = arith.constant 0 : i32
    %c0_i32_0 = arith.constant 0 : i32
    %c0_i32_1 = arith.constant 0 : i32
    return %c0_i32, %c0_i32_0 : i32, i32
  }
  func.func @transform_2(%arg0: i32) -> (i32, i32, i32) {
    %c0_i32 = arith.constant 0 : i32
    %c0_i32_0 = arith.constant 0 : i32
    %c0_i32_1 = arith.constant 0 : i32
    return %arg0, %c0_i32, %c0_i32_0 : i32, i32, i32
  }
}

</mosaic_0001>

<bundles_post_ra>
// kernel: tpu_custom_call.1
= control target key start
LH: loop header
LB: loop body
LE: loop exit
PB: predicated region body
PF: predicated region fallthrough
CT: control target
= control target key end

     0   :  { %7 = vsyncpa [#allocation3], 0  ;;  %s509_s0 = inlined_call_operand.hbm [shape: f32[1,8,16], index: 0, kind: input, shape index: {}]   ;;  %s510_s1 = inlined_call_operand.hbm [shape: f32[120,128], index: 1, kind: input, shape index: {}]   ;;  %s511_s2 = inlined_call_operand.vmem [shape: f32[1,8,4], index: 2, kind: output, shape index: {}]  }
   0x1   :  { %8 = vsyncpa [#allocation5], 0  ;;  %s456_s9 = smov [#allocation2]   ;;  %s457_s11 = smov [#allocation4]  }
   0x2   :  { %s15_s10 = sshll.u32 %s456_s9, 4  ;;  %s24_s12 = sshll.u32 %s457_s11, 4  ;;  %s16_s10 = int_to_ptr.vmem [resolvable:$true] %s15_s10  ;;  %s25_s12 = int_to_ptr.vmem [resolvable:$true] %s24_s12 }
   0x3   :  { %s420_s13 = scalar_lea.vmem %s16_s10, 128  ;;  %p425_p1 = scmp.lt.s32.totalorder %s16_s10, %s16_s10 }
   0x4   :  { %p421_p0 = scmp.ne.s32.totalorder %s16_s10, %s420_s13  ;;  %p426_p2 = scmp.lt.s32.totalorder %s420_s13, %s420_s13 }
   0x6   :  { %p427_p3 = por %p426_p2, %p425_p1 }
   0x8   :  { %p428_p4 = pnand %p427_p3, %p421_p0 }
   0xa   :  { %431 = shalt.err (!%p428_p4)
}
   0xb   :  { %18 = dma.hbm_to_vmem [thread:$0]  %s509_s0, 128, %s16_s10, [#allocation3]  }
   0xc   :  { %s440_s16 = scalar_lea.vmem %s25_s12, 1920  ;;  %p445_p6 = scmp.lt.s32.totalorder %s25_s12, %s25_s12 }
   0xd   :  { %p441_p5 = scmp.ne.s32.totalorder %s25_s12, %s440_s16  ;;  %p446_p7 = scmp.lt.s32.totalorder %s440_s16, %s440_s16 }
   0xf   :  { %p447_p8 = por %p446_p7, %p445_p6 }
  0x11   :  { %p448_p9 = pnand %p447_p8, %p441_p5 }
  0x13   :  { %451 = shalt.err (!%p448_p9)
}
  0x14   :  { %s458_s17 = smov 128   ;;  %s459_s18 = smov 8  }
  0x15   :  { %30 = dma.hbm_to_vmem [thread:$0]  %s510_s1, 1920, %s25_s12, [#allocation5], %s458_s17, %s458_s17, %s459_s18  }
  0x16   :  { %452 = dma.done.wait [#allocation3], 128  }
  0x17   :  { %453 = vsyncadd [#allocation3], 4294967168 }
  0x18   :  { %454 = dma.done.wait [#allocation5], 1920  }
  0x19   :  { %455 = vsyncadd [#allocation5], 4294965376  ;;  %v460_v0 = vmov 0.0   ;;  %vm461_vm0 = vmmov 0   ;;  %v39_v1 = vld [vmem:[#allocation4 + $0x8] sm:$0xff]  ;;  %v38_v2 = vld [vmem:[#allocation4] sm:$0xff]  ;;  %v166_v34 = vlaneseq }
  0x1a   :  { %364 = vmatprep.subr.mxu0 %v460_v0  ;;  %368 = vmatprep.mubr.msk.f32.mxu0 %vm461_vm0, %v460_v0  ;;  %v37_v3 = vld [vmem:[#allocation2] sm:$0xff]  ;;  %vm61_vm1 = vcmask 130048   ;;  %v341_v4 = vld [vmem:[#allocation4 + $0x10] ss:$0 sm:$0xff]  ;;  %s462_s0 = smov 64   ;;  %vm141_vm2 = vcmask 523264  }
  0x1b   :  { %371 = vmatprep.subr.mxu1 %v460_v0  ;;  %387 = vmatprep.mubr.msk.f32.mxu1 %vm461_vm0, %v460_v0  ;;  %v50_v20 = vld [vmem:[#allocation4 + $0x4b] sm:$0xff]  ;;  %v49_v21 = vld [vmem:[#allocation4 + $0x43] sm:$0xff]  ;;  %v48_v22 = vld [vmem:[#allocation4 + $0x3b] sm:$0xff]  ;;  %v167_v35 = vshrl.u32 %v166_v34, 7  ;;  %vm258_vm3 = vcmask 261120   ;;  %vm333_vm4 = vcmask 31744  }
  0x1c   :  { %365 = vmatpush3.msra.mxu0 %v39_v1  ;;  %372 = vmatpush3.msra.mxu1 %v50_v20  ;;  %v47_v27 = vld [vmem:[#allocation4 + $0x33] sm:$0xff]  ;;  %v46_v28 = vld [vmem:[#allocation4 + $0x2b] sm:$0xff]  ;;  %v45_v29 = vld [vmem:[#allocation4 + $0x23] sm:$0xff] }
  0x1d   :  { %366 = vmatprep.subr.mxu0 %v460_v0  ;;  %373 = vmatprep.subr.mxu1 %v460_v0  ;;  %v44_v30 = vld [vmem:[#allocation4 + $0x1b] sm:$0xff]  ;;  %v43_v31 = vld [vmem:[#allocation4 + $0x13] sm:$0xff]  ;;  %v41_v36 = vld [vmem:[#allocation4 + $0x11] sm:$0x1]  ;;  %v168_v37 = vsub.s32 0, %v167_v35 }
  0x1e   :  { %367 = vmatpush3.msra.mxu0 %v38_v2  ;;  %374 = vmatpush3.msra.mxu1 %v49_v21  ;;  %v55_v32 = vld [vmem:[#allocation4 + $0x6c] sm:$0xff]  ;;  %v54_v47 = vld [vmem:[#allocation4 + $0x64] sm:$0xff]  ;;  %v53_v48 = vld [vmem:[#allocation4 + $0x5c] sm:$0xff] }
  0x1f   :  { %369 = vmatmul.mubr.msk.f32.vlgmr.msra.gmra.mxu0 %vm61_vm1, %v37_v3  ;;  %390 = vmatprep.subr.mxu0 %v460_v0  ;;  %v42_v40 = vld [vmem:[#allocation4 + $0x12] sm:$0x1]  ;;  %v52_v49 = vld [vmem:[#allocation4 + $0x54] sm:$0xff]  ;;  %v343_v50 = vld [vmem:[#allocation4 + $0x53] ss:$0 sm:$0xff] }
  0x20   :  { %398 = vmatprep.mubr.msk.f32.mxu0 %vm461_vm0, %v460_v0  ;;  %375 = vmatprep.subr.mxu1 %v460_v0  ;;  %v345_v55 = vld [vmem:[#allocation4 + $0x74] ss:$0 sm:$0xff] }
  0x21   :  { %376 = vmatpush3.msra.mxu1 %v48_v22  ;;  %391 = vmatpush3.msra.mxu0 %v55_v32 }
  0x22   :  { %377 = vmatprep.subr.mxu1 %v460_v0  ;;  %392 = vmatprep.subr.mxu0 %v460_v0 }
  0x23   :  { %378 = vmatpush3.msra.mxu1 %v47_v27  ;;  %393 = vmatpush3.msra.mxu0 %v54_v47 }
  0x24   :  { %379 = vmatprep.subr.mxu1 %v460_v0  ;;  %394 = vmatprep.subr.mxu0 %v460_v0 }
  0x25   :  { %380 = vmatpush3.msra.mxu1 %v46_v28  ;;  %395 = vmatpush3.msra.mxu0 %v53_v48 }
  0x26   :  { %381 = vmatprep.subr.mxu1 %v460_v0  ;;  %396 = vmatprep.subr.mxu0 %v460_v0 }
  0x27   :  { %382 = vmatpush3.msra.mxu1 %v45_v29  ;;  %397 = vmatpush3.msra.mxu0 %v52_v49 }
  0x28   :  { %383 = vmatprep.subr.mxu1 %v460_v0 }
  0x29   :  { %384 = vmatpush3.msra.mxu1 %v44_v30 }
  0x2a   :  { %385 = vmatprep.subr.mxu1 %v460_v0 }
  0x2b   :  { %386 = vmatpush3.msra.mxu1 %v43_v31 }
  0xdf   :  { %v131_v5 = vpop.f32.mrf.mxu0 }
  0xe0   :  { %v132_v6 = vadd.f32 %v341_v4, %v131_v5 }
  0xe1   :  { %v370_v7 = vpop.f32.mrf.mxu0 }
  0xe2   :  { %v135_v8 = vmax.f32 %v132_v6, 0.0 }
  0xe4   :  { %v136_v9 = vmul.f32 %v135_v8, %v135_v8 }
  0xe6   :  { %138 = vrot.lane.b32.xlu0 %v136_v9, %s462_s0 }
 0x158   :  { %v139_v10 = vpop.permute.xlu0 %138 }
 0x159   :  { %v142_v11 = vsel %vm141_vm2, %v135_v8, %v139_v10 }
 0x15a   :  { %v143_v12 = vrot.slane %v142_v11, 4 }
 0x15c   :  { %v144_v13 = vadd.f32 %v143_v12, %v142_v11 }
 0x15e   :  { %v145_v14 = vrot.slane %v144_v13, 2 }
 0x160   :  { %v146_v15 = vadd.f32 %v145_v14, %v144_v13 }
 0x162   :  { %v147_v16 = vrot.slane %v146_v15, 1 }
 0x164   :  { %v148_v17 = vadd.f32 %v147_v16, %v146_v15 }
 0x166   :  { %v149_v18 = vmul.f32 0.125, %v148_v17 }
 0x168   :  { %v150_v19 = vmul.f32 %v149_v18, %v149_v18 }
 0x16a   :  { %152 = vrot.lane.b32.xlu0 %v150_v19, %s462_s0 }
 0x1dc   :  { %v153_v23 = vpop.permute.xlu0 %152 }
 0x1dd   :  { %v155_v24 = vsub.f32 %v149_v18, %v153_v23 }
 0x1df   :  { %v156_v25 = vmax.f32 %v155_v24, 0.0 }
 0x1e1   :  { %v157_v26 = vadd.f32 1e-05, %v156_v25 }
 0x1e3   :  { %408 = vrsqrt.f32 %v157_v26 }
 0x1f0   :  { %v409_v33 = vpop.eup %408 }
 0x1f1   :  { %160 = vrot.lane.b32.xlu1 %v409_v33, %s462_s0 }
 0x263   :  { %v161_v38 = vpop.permute.xlu1 %160 }
 0x264   :  { %v163_v39 = vmul.f32 %v161_v38, %v41_v36 }
 0x266   :  { %v164_v41 = vmul.f32 %v163_v39, %v149_v18  ;;  %v169_v42 = vrot.slane %v163_v39, %v168_v37 }
 0x268   :  { %v165_v43 = vsub.f32 %v42_v40, %v164_v41  ;;  %v170_v44 = vmul.f32 %v169_v42, %v135_v8 }
 0x26a   :  { %v174_v45 = vrot.slane %v165_v43, %v168_v37 }
 0x26c   :  { %v175_v46 = vadd.f32 %v174_v45, %v170_v44 }
 0x26e   :  { %388 = vmatmul.mubr.msk.f32.vlgmr.msra.gmra.mxu1 %vm141_vm2, %v175_v46 }
 0x32e   :  { %v249_v51 = vpop.f32.mrf.mxu1 }
 0x32f   :  { %v250_v52 = vadd.f32 %v343_v50, %v249_v51 }
 0x330   :  { %v389_v53 = vpop.f32.mrf.mxu1 }
 0x331   :  { %v253_v54 = vmax.f32 %v250_v52, 0.0 }
 0x333   :  { %399 = vmatmul.mubr.msk.f32.vlgmr.msra.gmra.mxu0 %vm258_vm3, %v253_v54 }
 0x3f3   :  { %v328_v56 = vpop.f32.mrf.mxu0 }
 0x3f4   :  { %v329_v57 = vadd.f32 %v345_v55, %v328_v56 }
 0x3f5   :  { %v400_v58 = vpop.f32.mrf.mxu0 }
 0x3f6   :  { %410 = vtanh.f32 %v329_v57 }
 0x403   :  { %v411_v59 = vpop.eup %410 }
 0x404   :  { %334 = vst.msk [vmem:[%s511_s2] sm:$0xff] %vm333_vm4, %v411_v59 }
 0x405   :  { %339 = vsyncpa [#allocation3], 1 }
 0x406   :  { %340 = vsyncpa [#allocation5], 1 }

</bundles_post_ra>
